<compile_context>
chip_gen: v7x
topology: tpu7x:2x2x1
jax: 0.10.0
libtpu: 0.0.40
codegen_flags: <defaults>
</compile_context>

<pallas_src>
import functools

import jax
import jax.numpy as jnp
from jax.experimental import pallas as pl
from jax.experimental.pallas import tpu as pltpu


def _round_up(x, m):
    return ((x + m - 1) // m) * m


def kamp_dnn_kernel(x_ref,
                    w1_ref, b1_ref,
                    w2_ref, b2_ref,
                    w3_ref, b3_ref,
                    w4_ref, b4_ref,
                    o_ref):
    # One batch tile per grid step; all weights resident in VMEM.
    compute_dt = w1_ref.dtype
    # Cast f32 activations to bf16 in-kernel (free on the VPU under the DMA).
    x = x_ref[...].astype(compute_dt)
    h = jnp.dot(x, w1_ref[...],
                preferred_element_type=jnp.float32) + b1_ref[...]
    h = jnp.maximum(h, 0.0)
    h = jnp.dot(h.astype(compute_dt), w2_ref[...],
                preferred_element_type=jnp.float32) + b2_ref[...]
    h = jnp.maximum(h, 0.0)
    h = jnp.dot(h.astype(compute_dt), w3_ref[...],
                preferred_element_type=jnp.float32) + b3_ref[...]
    h = jnp.maximum(h, 0.0)
    # Dropout: eval-mode => identity.
    # TODO(synk): training-mode dropout would use pltpu.prng_seed + prng_random_bits.
    out = jnp.dot(h.astype(compute_dt), w4_ref[...],
                  preferred_element_type=jnp.float32) + b4_ref[...]
    o_ref[...] = out.astype(o_ref.dtype)


def prepare_params(params, compute_dtype=jnp.bfloat16):
    """One-time parameter prep: bf16 weights [in, out], f32 biases (1, out).

    Call this once and reuse the result across forward calls so the per-call
    graph contains only the pallas_call.
    """
    return dict(
        w1=jnp.asarray(params["w1"], compute_dtype),
        w2=jnp.asarray(params["w2"], compute_dtype),
        w3=jnp.asarray(params["w3"], compute_dtype),
        w4=jnp.asarray(params["w4"], compute_dtype),
        b1=jnp.asarray(params["b1"], jnp.float32).reshape(1, -1),
        b2=jnp.asarray(params["b2"], jnp.float32).reshape(1, -1),
        b3=jnp.asarray(params["b3"], jnp.float32).reshape(1, -1),
        b4=jnp.asarray(params["b4"], jnp.float32).reshape(1, -1),
    )


@functools.partial(jax.jit, static_argnames=("tile_batch",))
def kamp_dnn_forward(x, prepared, *, tile_batch=8192):
    """x: [B, input_size] float32; prepared: output of prepare_params()."""
    B, input_size = x.shape
    hidden = prepared["w1"].shape[1]
    num_classes = prepared["w4"].shape[1]

    # --- batch tiling ------------------------------------------------------
    # TB multiple of 8; cap so the "parallel" grid axis has >=4 steps when the
    # batch allows it (v7x shards grid steps across its 2 TensorCores).
    B8 = _round_up(B, 8)
    tb_cap = max(8, _round_up(pl.cdiv(B8, 4), 8))
    TB = min(tile_batch, tb_cap)
    B_pad = _round_up(B, TB)
    x_in = x if B_pad == B else jnp.pad(x, ((0, B_pad - B), (0, 0)))
    grid = (B_pad // TB,)

    w1, w2, w3, w4 = prepared["w1"], prepared["w2"], prepared["w3"], prepared["w4"]
    b1, b2, b3, b4 = prepared["b1"], prepared["b2"], prepared["b3"], prepared["b4"]
    operands = (x_in, w1, b1, w2, b2, w3, b3, w4, b4)

    in_specs = [
        # activations: tiled along the batch grid axis (f32, cast in-kernel)
        pl.BlockSpec((TB, input_size), lambda i: (i, 0)),
        # weights / biases: whole-array blocks, constant index_map -> VMEM-resident
        pl.BlockSpec(w1.shape, lambda i: (0, 0)),
        pl.BlockSpec(b1.shape, lambda i: (0, 0)),
        pl.BlockSpec(w2.shape, lambda i: (0, 0)),
        pl.BlockSpec(b2.shape, lambda i: (0, 0)),
        pl.BlockSpec(w3.shape, lambda i: (0, 0)),
        pl.BlockSpec(b3.shape, lambda i: (0, 0)),
        pl.BlockSpec(w4.shape, lambda i: (0, 0)),
        pl.BlockSpec(b4.shape, lambda i: (0, 0)),
    ]
    # Unpadded output: last dim == full array dim (legal per the (8,128) rule).
    out_spec = pl.BlockSpec((TB, num_classes), lambda i: (i, 0))

    flops = 2 * B_pad * (input_size * hidden
                         + 2 * hidden * hidden
                         + hidden * num_classes)
    bytes_accessed = sum(int(op.size) * op.dtype.itemsize for op in operands)
    bytes_accessed += B_pad * num_classes * 4  # unpadded f32 output
    cost = pl.CostEstimate(flops=flops, transcendentals=0,
                           bytes_accessed=bytes_accessed)

    out_padded = pl.pallas_call(
        kamp_dnn_kernel,
        out_shape=jax.ShapeDtypeStruct((B_pad, num_classes), jnp.float32),
        grid=grid,
        in_specs=in_specs,
        out_specs=out_spec,
        compiler_params=pltpu.CompilerParams(
            dimension_semantics=("parallel",)),
        cost_estimate=cost,
    )(*operands)

    return out_padded[:B]


def init_params(key, input_size=4, hidden_size=32, num_classes=4):
    """Deterministic init matching nn.Linear shapes (weights stored [in, out])."""
    ks = jax.random.split(key, 8)

    def lin(kw, kb, fan_in, fan_out):
        bound = 1.0 / jnp.sqrt(fan_in)
        w = jax.random.uniform(kw, (fan_in, fan_out), jnp.float32, -bound, bound)
        b = jax.random.uniform(kb, (1, fan_out), jnp.float32, -bound, bound)
        return w, b

    w1, b1 = lin(ks[0], ks[1], input_size, hidden_size)
    w2, b2 = lin(ks[2], ks[3], hidden_size, hidden_size)
    w3, b3 = lin(ks[4], ks[5], hidden_size, hidden_size)
    w4, b4 = lin(ks[6], ks[7], hidden_size, num_classes)
    return dict(w1=w1, b1=b1, w2=w2, b2=b2, w3=w3, b3=b3, w4=w4, b4=b4)


def reference_forward(x, p):
    """Pure-JAX reference using the same bf16 rounding of x / weights / activations."""
    f = lambda a: a.astype(jnp.bfloat16).astype(jnp.float32)
    h = jnp.maximum(f(x) @ f(p["w1"]) + p["b1"], 0.0)
    h = jnp.maximum(f(h) @ f(p["w2"]) + p["b2"], 0.0)
    h = jnp.maximum(f(h) @ f(p["w3"]) + p["b3"], 0.0)
    return f(h) @ f(p["w4"]) + p["b4"]


if __name__ == "__main__":
    key = jax.random.PRNGKey(0)
    k_x, k_p, k_x2 = jax.random.split(key, 3)

    input_size, hidden_size, num_classes = 4, 32, 4
    params = init_params(k_p, input_size, hidden_size, num_classes)
    prepared = prepare_params(params)   # one-time param prep, reused below

    # Small batch (single grid step).
    batch = 8
    x = jax.random.normal(k_x, (batch, input_size), jnp.float32)
    out = jax.block_until_ready(kamp_dnn_forward(x, prepared))
    ref = reference_forward(x, params)
    assert out.shape == (batch, num_classes)
    assert jnp.allclose(out, ref, atol=1e-2, rtol=1e-2), \
        "mismatch vs reference (small batch)"

    # Larger, non-multiple batch to exercise batch tiling + padding (grid > 1).
    batch2 = 1030
    x2 = jax.random.normal(k_x2, (batch2, input_size), jnp.float32)
    out2 = jax.block_until_ready(kamp_dnn_forward(x2, prepared))
    ref2 = reference_forward(x2, params)
    assert out2.shape == (batch2, num_classes)
    assert jnp.allclose(out2, ref2, atol=1e-2, rtol=1e-2), \
        "mismatch vs reference (tiled batch)"

    print("KERNEL_OK")
</pallas_src>

<mosaic_0001>
module attributes {stable_mosaic.version = 11 : i64} {
  func.func @kamp_dnn_kernel(%arg0: i32, %arg1: memref<8x4xf32, #tpu.memory_space<vmem>>, %arg2: memref<4x32xbf16, #tpu.memory_space<vmem>>, %arg3: memref<1x32xf32, #tpu.memory_space<vmem>>, %arg4: memref<32x32xbf16, #tpu.memory_space<vmem>>, %arg5: memref<1x32xf32, #tpu.memory_space<vmem>>, %arg6: memref<32x32xbf16, #tpu.memory_space<vmem>>, %arg7: memref<1x32xf32, #tpu.memory_space<vmem>>, %arg8: memref<32x4xbf16, #tpu.memory_space<vmem>>, %arg9: memref<1x4xf32, #tpu.memory_space<vmem>>, %arg10: memref<8x4xf32, #tpu.memory_space<vmem>>) attributes {dimension_semantics = [#tpu.dimension_semantics<parallel>], iteration_bounds = array<i64: 1>, scalar_prefetch = 0 : i64, scratch_operands = 0 : i64, tpu.core_type = #tpu.core_type<tc>, window_params = [{transform_indices = @transform_0, window_bounds = array<i64: 8, 4>}, {pipeline_mode = #tpu.pipeline_mode<synchronous>, transform_indices = @transform_1, window_bounds = array<i64: 4, 32>}, {pipeline_mode = #tpu.pipeline_mode<synchronous>, transform_indices = @transform_2, window_bounds = array<i64: 1, 32>}, {pipeline_mode = #tpu.pipeline_mode<synchronous>, transform_indices = @transform_3, window_bounds = array<i64: 32, 32>}, {pipeline_mode = #tpu.pipeline_mode<synchronous>, transform_indices = @transform_4, window_bounds = array<i64: 1, 32>}, {pipeline_mode = #tpu.pipeline_mode<synchronous>, transform_indices = @transform_5, window_bounds = array<i64: 32, 32>}, {pipeline_mode = #tpu.pipeline_mode<synchronous>, transform_indices = @transform_6, window_bounds = array<i64: 1, 32>}, {pipeline_mode = #tpu.pipeline_mode<synchronous>, transform_indices = @transform_7, window_bounds = array<i64: 32, 4>}, {pipeline_mode = #tpu.pipeline_mode<synchronous>, transform_indices = @transform_8, window_bounds = array<i64: 1, 4>}, {transform_indices = @transform_9, window_bounds = array<i64: 8, 4>}]} {
    %c0 = arith.constant 0 : index
    %c0_0 = arith.constant 0 : index
    %0 = vector.load %arg1[%c0, %c0_0] : memref<8x4xf32, #tpu.memory_space<vmem>>, vector<8x4xf32>
    %1 = arith.truncf %0 : vector<8x4xf32> to vector<8x4xbf16>
    %c0_1 = arith.constant 0 : index
    %c0_2 = arith.constant 0 : index
    %2 = vector.load %arg2[%c0_1, %c0_2] : memref<4x32xbf16, #tpu.memory_space<vmem>>, vector<4x32xbf16>
    %cst = arith.constant dense<0.000000e+00> : vector<8x32xf32>
    %3 = tpu.matmul %1, %2, %cst {dimension_numbers = #tpu.dot_dimension_numbers<[1], [0], [0], [1], [0, 0, 1, 1], [], []>} : vector<8x4xbf16>, vector<4x32xbf16>, vector<8x32xf32> -> vector<8x32xf32>
    %c0_3 = arith.constant 0 : index
    %c0_4 = arith.constant 0 : index
    %4 = vector.load %arg3[%c0_3, %c0_4] : memref<1x32xf32, #tpu.memory_space<vmem>>, vector<1x32xf32>
    %5 = vector.broadcast %4 : vector<1x32xf32> to vector<8x32xf32>
    %6 = arith.addf %3, %5 : vector<8x32xf32>
    %cst_5 = arith.constant 0.000000e+00 : f32
    %7 = vector.broadcast %cst_5 : f32 to vector<8x32xf32>
    %8 = arith.maximumf %6, %7 : vector<8x32xf32>
    %9 = arith.truncf %8 : vector<8x32xf32> to vector<8x32xbf16>
    %c0_6 = arith.constant 0 : index
    %c0_7 = arith.constant 0 : index
    %10 = vector.load %arg4[%c0_6, %c0_7] : memref<32x32xbf16, #tpu.memory_space<vmem>>, vector<32x32xbf16>
    %cst_8 = arith.constant dense<0.000000e+00> : vector<8x32xf32>
    %11 = tpu.matmul %9, %10, %cst_8 {dimension_numbers = #tpu.dot_dimension_numbers<[1], [0], [0], [1], [0, 0, 1, 1], [], []>} : vector<8x32xbf16>, vector<32x32xbf16>, vector<8x32xf32> -> vector<8x32xf32>
    %c0_9 = arith.constant 0 : index
    %c0_10 = arith.constant 0 : index
    %12 = vector.load %arg5[%c0_9, %c0_10] : memref<1x32xf32, #tpu.memory_space<vmem>>, vector<1x32xf32>
    %13 = vector.broadcast %12 : vector<1x32xf32> to vector<8x32xf32>
    %14 = arith.addf %11, %13 : vector<8x32xf32>
    %cst_11 = arith.constant 0.000000e+00 : f32
    %15 = vector.broadcast %cst_11 : f32 to vector<8x32xf32>
    %16 = arith.maximumf %14, %15 : vector<8x32xf32>
    %17 = arith.truncf %16 : vector<8x32xf32> to vector<8x32xbf16>
    %c0_12 = arith.constant 0 : index
    %c0_13 = arith.constant 0 : index
    %18 = vector.load %arg6[%c0_12, %c0_13] : memref<32x32xbf16, #tpu.memory_space<vmem>>, vector<32x32xbf16>
    %cst_14 = arith.constant dense<0.000000e+00> : vector<8x32xf32>
    %19 = tpu.matmul %17, %18, %cst_14 {dimension_numbers = #tpu.dot_dimension_numbers<[1], [0], [0], [1], [0, 0, 1, 1], [], []>} : vector<8x32xbf16>, vector<32x32xbf16>, vector<8x32xf32> -> vector<8x32xf32>
    %c0_15 = arith.constant 0 : index
    %c0_16 = arith.constant 0 : index
    %20 = vector.load %arg7[%c0_15, %c0_16] : memref<1x32xf32, #tpu.memory_space<vmem>>, vector<1x32xf32>
    %21 = vector.broadcast %20 : vector<1x32xf32> to vector<8x32xf32>
    %22 = arith.addf %19, %21 : vector<8x32xf32>
    %cst_17 = arith.constant 0.000000e+00 : f32
    %23 = vector.broadcast %cst_17 : f32 to vector<8x32xf32>
    %24 = arith.maximumf %22, %23 : vector<8x32xf32>
    %25 = arith.truncf %24 : vector<8x32xf32> to vector<8x32xbf16>
    %c0_18 = arith.constant 0 : index
    %c0_19 = arith.constant 0 : index
    %26 = vector.load %arg8[%c0_18, %c0_19] : memref<32x4xbf16, #tpu.memory_space<vmem>>, vector<32x4xbf16>
    %cst_20 = arith.constant dense<0.000000e+00> : vector<8x4xf32>
    %27 = tpu.matmul %25, %26, %cst_20 {dimension_numbers = #tpu.dot_dimension_numbers<[1], [0], [0], [1], [0, 0, 1, 1], [], []>} : vector<8x32xbf16>, vector<32x4xbf16>, vector<8x4xf32> -> vector<8x4xf32>
    %c0_21 = arith.constant 0 : index
    %c0_22 = arith.constant 0 : index
    %28 = vector.load %arg9[%c0_21, %c0_22] : memref<1x4xf32, #tpu.memory_space<vmem>>, vector<1x4xf32>
    %29 = vector.broadcast %28 : vector<1x4xf32> to vector<8x4xf32>
    %30 = arith.addf %27, %29 : vector<8x4xf32>
    %c0_23 = arith.constant 0 : index
    %c0_24 = arith.constant 0 : index
    %31 = vector.load %arg10[%c0_23, %c0_24] : memref<8x4xf32, #tpu.memory_space<vmem>>, vector<8x4xf32>
    tpu.vector_store %arg10[%c0_23, %c0_24], %30 {strides = array<i32>} : memref<8x4xf32, #tpu.memory_space<vmem>>, vector<8x4xf32>,
    return
  }
  func.func @transform_0(%arg0: i32) -> (i32, i32) {
    %c0_i32 = arith.constant 0 : i32
    %c0_i32_0 = arith.constant 0 : i32
    return %arg0, %c0_i32 : i32, i32
  }
  func.func @transform_1(%arg0: i32) -> (i32, i32) {
    %c0_i32 = arith.constant 0 : i32
    %c0_i32_0 = arith.constant 0 : i32
    %c0_i32_1 = arith.constant 0 : i32
    return %c0_i32, %c0_i32_0 : i32, i32
  }
  func.func @transform_2(%arg0: i32) -> (i32, i32) {
    %c0_i32 = arith.constant 0 : i32
    %c0_i32_0 = arith.constant 0 : i32
    %c0_i32_1 = arith.constant 0 : i32
    return %c0_i32, %c0_i32_0 : i32, i32
  }
  func.func @transform_3(%arg0: i32) -> (i32, i32) {
    %c0_i32 = arith.constant 0 : i32
    %c0_i32_0 = arith.constant 0 : i32
    %c0_i32_1 = arith.constant 0 : i32
    return %c0_i32, %c0_i32_0 : i32, i32
  }
  func.func @transform_4(%arg0: i32) -> (i32, i32) {
    %c0_i32 = arith.constant 0 : i32
    %c0_i32_0 = arith.constant 0 : i32
    %c0_i32_1 = arith.constant 0 : i32
    return %c0_i32, %c0_i32_0 : i32, i32
  }
  func.func @transform_5(%arg0: i32) -> (i32, i32) {
    %c0_i32 = arith.constant 0 : i32
    %c0_i32_0 = arith.constant 0 : i32
    %c0_i32_1 = arith.constant 0 : i32
    return %c0_i32, %c0_i32_0 : i32, i32
  }
  func.func @transform_6(%arg0: i32) -> (i32, i32) {
    %c0_i32 = arith.constant 0 : i32
    %c0_i32_0 = arith.constant 0 : i32
    %c0_i32_1 = arith.constant 0 : i32
    return %c0_i32, %c0_i32_0 : i32, i32
  }
  func.func @transform_7(%arg0: i32) -> (i32, i32) {
    %c0_i32 = arith.constant 0 : i32
    %c0_i32_0 = arith.constant 0 : i32
    %c0_i32_1 = arith.constant 0 : i32
    return %c0_i32, %c0_i32_0 : i32, i32
  }
  func.func @transform_8(%arg0: i32) -> (i32, i32) {
    %c0_i32 = arith.constant 0 : i32
    %c0_i32_0 = arith.constant 0 : i32
    %c0_i32_1 = arith.constant 0 : i32
    return %c0_i32, %c0_i32_0 : i32, i32
  }
  func.func @transform_9(%arg0: i32) -> (i32, i32) {
    %c0_i32 = arith.constant 0 : i32
    %c0_i32_0 = arith.constant 0 : i32
    return %arg0, %c0_i32 : i32, i32
  }
}

</mosaic_0001>

<bundles_post_ra>
// kernel: kamp_dnn_forward.1
= control target key start
LH: loop header
LB: loop body
LE: loop exit
PB: predicated region body
PF: predicated region fallthrough
CT: control target
= control target key end

     0   :  { %14 = vsyncpa [#allocation3], 0  ;;  %s402_s30 = smov [#allocation2]   ;;  %s512_s0 = inlined_call_operand.vmem [shape: f32[8,4], index: 0, kind: input, shape index: {}]   ;;  %s513_s1 = inlined_call_operand.vmem [shape: bf16[4,32], index: 1, kind: input, shape index: {}]   ;;  %s514_s2 = inlined_call_operand.vmem [shape: f32[1,32], index: 2, kind: input, shape index: {}]   ;;  %s515_s3 = inlined_call_operand.vmem [shape: bf16[32,32], index: 3, kind: input, shape index: {}]   ;;  %s516_s4 = inlined_call_operand.hbm [shape: f32[1,32], index: 4, kind: input, shape index: {}]   ;;  %s517_s5 = inlined_call_operand.vmem [shape: bf16[32,32], index: 5, kind: input, shape index: {}]   ;;  %s518_s6 = inlined_call_operand.vmem [shape: f32[1,32], index: 6, kind: input, shape index: {}]   ;;  %s519_s7 = inlined_call_operand.vmem [shape: bf16[32,4], index: 7, kind: input, shape index: {}]   ;;  %s520_s8 = inlined_call_operand.vmem [shape: f32[1,4], index: 8, kind: input, shape index: {}]   ;;  %s521_s9 = inlined_call_operand.vmem [shape: f32[8,4], index: 9, kind: output, shape index: {}]  }
   0x1   :  { %s29_s10 = sshll.u32 %s402_s30, 4  ;;  %s378_s13 = scalar_lea.hbm %s516_s4, 16  ;;  %s30_s10 = int_to_ptr.vmem [resolvable:$true] %s29_s10 }
   0x2   :  { %p379_p0 = scmp.ne.s32.totalorder %s516_s4, %s378_s13  ;;  %p382_p1 = scmp.lt.u32.totalorder %s378_s13, %s516_s4 }
   0x4   :  { %p384_p2 = pnand %p382_p1, %p379_p0 }
   0x6   :  { %387 = shalt.err (!%p384_p2)
}
   0x7   :  { %s388_s18 = scalar_lea.vmem %s30_s10, 16  ;;  %s392_s19 = scalar_lea.vmem %s30_s10, 32 }
   0x8   :  { %p389_p3 = scmp.ne.s32.totalorder %s30_s10, %s388_s18  ;;  %p393_p4 = scmp.lt.s32.totalorder %s30_s10, %s30_s10 }
   0x9   :  { %p394_p5 = scmp.lt.s32.totalorder %s392_s19, %s388_s18 }
   0xb   :  { %p395_p6 = por %p394_p5, %p393_p4 }
   0xd   :  { %p396_p7 = pnand %p395_p6, %p389_p3 }
   0xf   :  { %399 = shalt.err (!%p396_p7)
}
  0x10   :  { %32 = dma.hbm_to_vmem [thread:$0]  %s516_s4, 16, %s30_s10, [#allocation3]  }
  0x11   :  { %400 = dma.done.wait [#allocation3], 16  }
  0x12   :  { %401 = vsyncadd [#allocation3], 4294967280  ;;  %v403_v0 = vmov 0.0   ;;  %vm404_vm0 = vmmov 0   ;;  %vm59_vm1 = vcmask 1041408   ;;  %v45_v2 = vld [vmem:[%s512_s0] sm:$0xff] }
  0x13   :  { %339 = vmatprep.subr.bf16.mxu0 %v403_v0  ;;  %341 = vmatprep.mubr.msk.bf16.mxu0 %vm404_vm0, %v403_v0  ;;  %v47_v1 = vld [vmem:[%s513_s1] sm:$0x3]  ;;  %v46_v4 = vpack.c.bf16 %v45_v2, %v45_v2  ;;  %vm55_vm2 = vcmask 31744   ;;  %v373_v6 = vld [vmem:[%s515_s3 + $0x8] sm:$0xff]   ;;  %vm128_vm3 = vcmask 261120  }
  0x14   :  { %345 = vmatprep.subr.bf16.mxu1 %v403_v0  ;;  %349 = vmatprep.mubr.msk.bf16.mxu1 %vm404_vm0, %v403_v0  ;;  %v61_v3 = vsel %vm59_vm1, %v47_v1, 0  ;;  %v372_v5 = vld [vmem:[%s515_s3] sm:$0xff]   ;;  %v375_v16 = vld [vmem:[%s517_s5 + $0x8] sm:$0xff]  }
  0x15   :  { %340 = vmatpush3.bf16.msra.mxu0 %v61_v3  ;;  %346 = vmatpush3.bf16.msra.mxu1 %v372_v5  ;;  %v374_v7 = vld [vmem:[%s517_s5] sm:$0xff]   ;;  %v377_v26 = vld [vmem:[%s519_s7 + $0x8] sm:$0xff]  }
  0x16   :  { %353 = vmatprep.subr.bf16.mxu0 %v403_v0  ;;  %347 = vmatprep.subr.bf16.mxu1 %v403_v0  ;;  %v314_v8 = vld [vmem:[%s514_s2] ss:$0 sm:$0xff] }
  0x17   :  { %v376_v17 = vld [vmem:[%s519_s7] sm:$0xff]  }
  0x18   :  { %342 = vmatmul.mubr.msk.bf16.vlgmr.msra.gmra.mrb[0].mxu0 %vm55_vm2, %v46_v4  ;;  %v316_v18 = vld [vmem:[#allocation2] ss:$0 sm:$0xff] }
  0x19   :  { %357 = vmatprep.mubr.msk.bf16.mxu0 %vm404_vm0, %v403_v0  ;;  %348 = vmatpush3.bf16.msra.mxu1 %v373_v6  ;;  %v320_v27 = vld [vmem:[%s518_s6] ss:$0 sm:$0xff] }
  0x1a   :  { %361 = vmatprep.subr.bf16.mxu1 %v403_v0  ;;  %354 = vmatpush3.bf16.msra.mxu0 %v374_v7  ;;  %v324_v35 = vld [vmem:[%s520_s8] ss:$0 sm:$0xff] }
  0x1b   :  { %355 = vmatprep.subr.bf16.mxu0 %v403_v0 }
  0x1e   :  { %356 = vmatpush3.bf16.msra.mxu0 %v375_v16 }
  0xeb   :  { %v97_v9 = vpop.f32.mrb[0].mxu0 }
  0xec   :  { %v98_v10 = vadd.f32 %v314_v8, %v97_v9  ;;  %v343_v11 = vpop.f32.mrb[1].mxu0 }
  0xed   :  { %v100_v12 = vpop.f32.mrb[2].mxu0 }
  0xee   :  { %v103_v13 = vmax.f32 %v98_v10, 0.0  ;;  %v344_v14 = vpop.f32.mrb[3].mxu0 }
  0xf0   :  { %v104_v15 = vpack.c.bf16 %v103_v13, %v103_v13 }
  0xf2   :  { %350 = vmatmul.mubr.msk.bf16.vlgmr.msra.gmra.mrb[0].mxu1 %vm128_vm3, %v104_v15 }
  0xf3   :  { %365 = vmatprep.mubr.msk.bf16.mxu1 %vm404_vm0, %v403_v0  ;;  %362 = vmatpush3.bf16.msra.mxu1 %v376_v17 }
  0xf4   :  { %363 = vmatprep.subr.bf16.mxu1 %v403_v0 }
  0xf7   :  { %364 = vmatpush3.bf16.msra.mxu1 %v377_v26 }
 0x1c5   :  { %v166_v19 = vpop.f32.mrb[0].mxu1 }
 0x1c6   :  { %v167_v20 = vadd.f32 %v316_v18, %v166_v19  ;;  %v351_v21 = vpop.f32.mrb[1].mxu1 }
 0x1c7   :  { %v169_v22 = vpop.f32.mrb[2].mxu1 }
 0x1c8   :  { %v172_v23 = vmax.f32 %v167_v20, 0.0  ;;  %v352_v24 = vpop.f32.mrb[3].mxu1 }
 0x1ca   :  { %v173_v25 = vpack.c.bf16 %v172_v23, %v172_v23 }
 0x1cc   :  { %358 = vmatmul.mubr.msk.bf16.vlgmr.msra.gmra.mrb[4].mxu0 %vm128_vm3, %v173_v25 }
 0x29f   :  { %v234_v28 = vpop.f32.mrb[4].mxu0 }
 0x2a0   :  { %v235_v29 = vadd.f32 %v320_v27, %v234_v28  ;;  %v359_v30 = vpop.f32.mrb[5].mxu0 }
 0x2a1   :  { %v237_v31 = vpop.f32.mrb[6].mxu0 }
 0x2a2   :  { %v240_v32 = vmax.f32 %v235_v29, 0.0  ;;  %v360_v33 = vpop.f32.mrb[7].mxu0 }
 0x2a4   :  { %v241_v34 = vpack.c.bf16 %v240_v32, %v240_v32 }
 0x2a6   :  { %366 = vmatmul.mubr.msk.bf16.vlgmr.msra.gmra.mrb[4].mxu1 %vm128_vm3, %v241_v34 }
 0x379   :  { %v302_v36 = vpop.f32.mrb[4].mxu1 }
 0x37a   :  { %v303_v37 = vadd.f32 %v324_v35, %v302_v36  ;;  %v367_v38 = vpop.f32.mrb[5].mxu1 }
 0x37b   :  { %v305_v39 = vpop.f32.mrb[6].mxu1 }
 0x37c   :  { %308 = vst.msk [vmem:[%s521_s9] sm:$0xff] %vm55_vm2, %v303_v37  ;;  %v368_v40 = vpop.f32.mrb[7].mxu1 }
 0x37d   :  { %313 = vsyncpa [#allocation3], 1 }

</bundles_post_ra>
